<compile_context>
chip_gen: v7x
topology: tpu7x:2x2x1
jax: 0.10.0
libtpu: 0.0.40
codegen_flags: <defaults>
</compile_context>

<pallas_src>
import jax
import jax.numpy as jnp
from jax.experimental import pallas as pl
from jax.experimental.pallas import tpu as pltpu


def _round_up(x, m):
    return ((x + m - 1) // m) * m


def _shortcut_kernel(xa_ref, xb_ref, w0_ref, w1_ref, bias_ref, o_ref):
    # xa_ref, xb_ref : (in_ch, PT)   channels on sublanes, pixels on lanes
    # w0_ref, w1_ref : (half, in_ch) BN-scale-folded grouped conv weights
    # bias_ref       : (out_ch, 1)   folded conv bias + BatchNorm shift
    # o_ref          : (out_ch, PT)  lane-dense output tile (already NCHW-flat)
    xa = jnp.maximum(xa_ref[...], 0.0)                     # ReLU (group 0)
    xb = jnp.maximum(xb_ref[...], 0.0)                     # ReLU (group 1)
    y0 = jnp.dot(w0_ref[...], xa, preferred_element_type=jnp.float32)
    y1 = jnp.dot(w1_ref[...], xb, preferred_element_type=jnp.float32)
    y = jnp.concatenate([y0, y1], axis=0) + bias_ref[...]
    o_ref[...] = y.astype(o_ref.dtype)


def shortcut_forward(x_nchw, conv_w, conv_b, bn_gamma, bn_beta, bn_mean, bn_var,
                     *, eps=1e-5, pt=512):
    """x_nchw: (N, in_ch, H, W).  conv_w: (out_ch, in_ch, 1, 1) grouped weight."""
    n, in_ch, h, w = x_nchw.shape
    out_ch = conv_w.shape[0]
    assert out_ch % 2 == 0, "groups=2 conv requires an even out_ch"
    half = out_ch // 2

    # --- glue: strided even/odd downsample, kept channels-first (no transpose) ---
    xa = x_nchw[:, :, 0::2, 0::2]                 # (N, in_ch, H2, W2)
    xb = x_nchw[:, :, 1::2, 1::2]
    h2, w2 = xa.shape[2], xa.shape[3]
    px = h2 * w2

    xa = xa.reshape(n, in_ch, px).astype(jnp.float32)
    xb = xb.reshape(n, in_ch, px).astype(jnp.float32)

    # lane-dense pixel tile: multiple of 128, clamped to the (padded) pixel count
    pt_eff = min(pt, _round_up(px, 128))
    pt_eff = max(128, (pt_eff // 128) * 128)
    px_pad = _round_up(px, pt_eff)
    if px_pad != px:
        pad = ((0, 0), (0, 0), (0, px_pad - px))
        xa = jnp.pad(xa, pad)
        xb = jnp.pad(xb, pad)

    # --- fold eval-mode BatchNorm scale into the grouped weights; keep bias ---
    w2d = conv_w[:, :, 0, 0].astype(jnp.float32)            # (out_ch, in_ch)
    inv_std = 1.0 / jnp.sqrt(bn_var.astype(jnp.float32) + eps)
    scale = bn_gamma.astype(jnp.float32) * inv_std           # (out_ch,)
    w_s = w2d * scale[:, None]
    w0 = w_s[:half]                                          # group 0 weight
    w1 = w_s[half:]                                          # group 1 weight
    bias = (((conv_b - bn_mean) * scale + bn_beta)
            .astype(jnp.float32).reshape(out_ch, 1))

    grid = (n, px_pad // pt_eff)

    # VMEM budget: double-buffered in/out tiles + weights; lift v5e's 16 MiB
    # default but stay well under v7x's 64 MiB physical VMEM.
    block_bytes = 4 * pt_eff * (2 * in_ch + out_ch)
    weights_bytes = 4 * (out_ch * in_ch + out_ch)
    vmem_limit = int(min(max(4 * (2 * block_bytes + weights_bytes),
                             32 * 1024 * 1024),
                         48 * 1024 * 1024))

    flops = 2 * n * px_pad * in_ch * out_ch
    bytes_accessed = 4 * (n * px_pad * (2 * in_ch + out_ch)
                          + out_ch * in_ch + out_ch)

    out = pl.pallas_call(
        _shortcut_kernel,
        out_shape=jax.ShapeDtypeStruct((n, out_ch, px_pad), jnp.float32),
        grid_spec=pltpu.PrefetchScalarGridSpec(
            num_scalar_prefetch=0,
            grid=grid,
            in_specs=[
                pl.BlockSpec((None, in_ch, pt_eff), lambda b, p: (b, 0, p)),
                pl.BlockSpec((None, in_ch, pt_eff), lambda b, p: (b, 0, p)),
                pl.BlockSpec((half, in_ch), lambda b, p: (0, 0)),
                pl.BlockSpec((half, in_ch), lambda b, p: (0, 0)),
                pl.BlockSpec((out_ch, 1), lambda b, p: (0, 0)),
            ],
            out_specs=pl.BlockSpec((None, out_ch, pt_eff), lambda b, p: (b, 0, p)),
        ),
        compiler_params=pltpu.CompilerParams(
            dimension_semantics=("parallel", "parallel"),
            vmem_limit_bytes=vmem_limit),
        cost_estimate=pl.CostEstimate(
            flops=int(flops), transcendentals=0,
            bytes_accessed=int(bytes_accessed)),
    )(xa, xb, w0, w1, bias)

    # drop lane padding; output is already channels-first -> just reshape to NCHW
    out = out[:, :, :px].reshape(n, out_ch, h2, w2)
    return out


def _reference(x_nchw, conv_w, conv_b, bn_gamma, bn_beta, bn_mean, bn_var, eps=1e-5):
    """Plain-JAX reference of the same forward (eval-mode BN)."""
    in_ch = x_nchw.shape[1]
    out_ch = conv_w.shape[0]
    half = out_ch // 2
    xcat = jnp.concatenate(
        [x_nchw[..., 0::2, 0::2], x_nchw[..., 1::2, 1::2]], axis=1)
    xr = jnp.maximum(xcat, 0.0)                             # (N, 2C, H2, W2)
    w2d = conv_w[:, :, 0, 0]
    g0 = jnp.einsum("nchw,oc->nohw", xr[:, :in_ch], w2d[:half])
    g1 = jnp.einsum("nchw,oc->nohw", xr[:, in_ch:], w2d[half:])
    y = jnp.concatenate([g0, g1], axis=1) + conv_b[None, :, None, None]
    inv_std = 1.0 / jnp.sqrt(bn_var + eps)
    y = (y - bn_mean[None, :, None, None]) * (bn_gamma * inv_std)[None, :, None, None] \
        + bn_beta[None, :, None, None]
    return y


if __name__ == "__main__":
    in_ch, out_ch = 4, 8          # stride arg of ShortCut is unused in forward
    N, H, W = 2, 16, 16

    key = jax.random.PRNGKey(0)
    kx, kw, kb, kg, kbt, km, kv = jax.random.split(key, 7)

    x = jax.random.normal(kx, (N, in_ch, H, W), dtype=jnp.float32)
    conv_w = jax.random.normal(kw, (out_ch, in_ch, 1, 1), dtype=jnp.float32) * 0.1
    conv_b = jax.random.normal(kb, (out_ch,), dtype=jnp.float32) * 0.1
    bn_gamma = 1.0 + 0.1 * jax.random.normal(kg, (out_ch,), dtype=jnp.float32)
    bn_beta = 0.1 * jax.random.normal(kbt, (out_ch,), dtype=jnp.float32)
    bn_mean = 0.1 * jax.random.normal(km, (out_ch,), dtype=jnp.float32)
    bn_var = jnp.abs(jax.random.normal(kv, (out_ch,), dtype=jnp.float32)) + 0.5

    out = shortcut_forward(x, conv_w, conv_b, bn_gamma, bn_beta, bn_mean, bn_var)
    out = jax.block_until_ready(out)

    ref = _reference(x, conv_w, conv_b, bn_gamma, bn_beta, bn_mean, bn_var)
    assert out.shape == (N, out_ch, H // 2, W // 2), out.shape
    assert jnp.allclose(out, ref, atol=1e-4, rtol=1e-4), \
        float(jnp.max(jnp.abs(out - ref)))

    print("KERNEL_OK")
</pallas_src>

<mosaic_0001>
module attributes {stable_mosaic.version = 11 : i64} {
  func.func @_shortcut_kernel(%arg0: i32, %arg1: i32, %arg2: memref<1x4x128xf32, #tpu.memory_space<vmem>>, %arg3: memref<1x4x128xf32, #tpu.memory_space<vmem>>, %arg4: memref<4x4xf32, #tpu.memory_space<vmem>>, %arg5: memref<4x4xf32, #tpu.memory_space<vmem>>, %arg6: memref<8x1xf32, #tpu.memory_space<vmem>>, %arg7: memref<1x8x128xf32, #tpu.memory_space<vmem>>) attributes {dimension_semantics = [#tpu.dimension_semantics<parallel>, #tpu.dimension_semantics<parallel>], iteration_bounds = array<i64: 2, 1>, scalar_prefetch = 0 : i64, scratch_operands = 0 : i64, tpu.core_type = #tpu.core_type<tc>, window_params = [{transform_indices = @transform_0, window_bounds = array<i64: 1, 4, 128>}, {transform_indices = @transform_1, window_bounds = array<i64: 1, 4, 128>}, {pipeline_mode = #tpu.pipeline_mode<synchronous>, transform_indices = @transform_2, window_bounds = array<i64: 4, 4>}, {pipeline_mode = #tpu.pipeline_mode<synchronous>, transform_indices = @transform_3, window_bounds = array<i64: 4, 4>}, {pipeline_mode = #tpu.pipeline_mode<synchronous>, transform_indices = @transform_4, window_bounds = array<i64: 8, 1>}, {transform_indices = @transform_5, window_bounds = array<i64: 1, 8, 128>}]} {
    %c0 = arith.constant 0 : index
    %c0_0 = arith.constant 0 : index
    %c0_1 = arith.constant 0 : index
    %0 = vector.load %arg2[%c0, %c0_0, %c0_1] : memref<1x4x128xf32, #tpu.memory_space<vmem>>, vector<1x4x128xf32>
    %1 = vector.shape_cast %0 : vector<1x4x128xf32> to vector<4x128xf32>
    %cst = arith.constant 0.000000e+00 : f32
    %2 = vector.broadcast %cst : f32 to vector<4x128xf32>
    %3 = arith.maximumf %1, %2 : vector<4x128xf32>
    %c0_2 = arith.constant 0 : index
    %c0_3 = arith.constant 0 : index
    %c0_4 = arith.constant 0 : index
    %4 = vector.load %arg3[%c0_2, %c0_3, %c0_4] : memref<1x4x128xf32, #tpu.memory_space<vmem>>, vector<1x4x128xf32>
    %5 = vector.shape_cast %4 : vector<1x4x128xf32> to vector<4x128xf32>
    %cst_5 = arith.constant 0.000000e+00 : f32
    %6 = vector.broadcast %cst_5 : f32 to vector<4x128xf32>
    %7 = arith.maximumf %5, %6 : vector<4x128xf32>
    %c0_6 = arith.constant 0 : index
    %c0_7 = arith.constant 0 : index
    %8 = vector.load %arg4[%c0_6, %c0_7] : memref<4x4xf32, #tpu.memory_space<vmem>>, vector<4x4xf32>
    %cst_8 = arith.constant dense<0.000000e+00> : vector<4x128xf32>
    %9 = tpu.matmul %8, %3, %cst_8 {dimension_numbers = #tpu.dot_dimension_numbers<[1], [0], [0], [1], [0, 0, 1, 1], [], []>} : vector<4x4xf32>, vector<4x128xf32>, vector<4x128xf32> -> vector<4x128xf32>
    %c0_9 = arith.constant 0 : index
    %c0_10 = arith.constant 0 : index
    %10 = vector.load %arg5[%c0_9, %c0_10] : memref<4x4xf32, #tpu.memory_space<vmem>>, vector<4x4xf32>
    %cst_11 = arith.constant dense<0.000000e+00> : vector<4x128xf32>
    %11 = tpu.matmul %10, %7, %cst_11 {dimension_numbers = #tpu.dot_dimension_numbers<[1], [0], [0], [1], [0, 0, 1, 1], [], []>} : vector<4x4xf32>, vector<4x128xf32>, vector<4x128xf32> -> vector<4x128xf32>
    %12 = tpu.concatenate %9, %11 in 0 : vector<4x128xf32>, vector<4x128xf32> -> vector<8x128xf32>
    %c0_12 = arith.constant 0 : index
    %c0_13 = arith.constant 0 : index
    %13 = vector.load %arg6[%c0_12, %c0_13] : memref<8x1xf32, #tpu.memory_space<vmem>>, vector<8x1xf32>
    %14 = vector.broadcast %13 : vector<8x1xf32> to vector<8x128xf32>
    %15 = arith.addf %12, %14 : vector<8x128xf32>
    %c0_14 = arith.constant 0 : index
    %c0_15 = arith.constant 0 : index
    %c0_16 = arith.constant 0 : index
    %16 = vector.load %arg7[%c0_14, %c0_15, %c0_16] : memref<1x8x128xf32, #tpu.memory_space<vmem>>, vector<1x8x128xf32>
    %17 = vector.shape_cast %16 : vector<1x8x128xf32> to vector<8x128xf32>
    %18 = vector.shape_cast %15 : vector<8x128xf32> to vector<1x8x128xf32>
    tpu.vector_store %arg7[%c0_14, %c0_15, %c0_16], %18 {strides = array<i32>} : memref<1x8x128xf32, #tpu.memory_space<vmem>>, vector<1x8x128xf32>,
    return
  }
  func.func @transform_0(%arg0: i32, %arg1: i32) -> (i32, i32, i32) {
    %c0_i32 = arith.constant 0 : i32
    %c0_i32_0 = arith.constant 0 : i32
    return %arg0, %c0_i32, %arg1 : i32, i32, i32
  }
  func.func @transform_1(%arg0: i32, %arg1: i32) -> (i32, i32, i32) {
    %c0_i32 = arith.constant 0 : i32
    %c0_i32_0 = arith.constant 0 : i32
    return %arg0, %c0_i32, %arg1 : i32, i32, i32
  }
  func.func @transform_2(%arg0: i32, %arg1: i32) -> (i32, i32) {
    %c0_i32 = arith.constant 0 : i32
    %c0_i32_0 = arith.constant 0 : i32
    %c0_i32_1 = arith.constant 0 : i32
    return %c0_i32, %c0_i32_0 : i32, i32
  }
  func.func @transform_3(%arg0: i32, %arg1: i32) -> (i32, i32) {
    %c0_i32 = arith.constant 0 : i32
    %c0_i32_0 = arith.constant 0 : i32
    %c0_i32_1 = arith.constant 0 : i32
    return %c0_i32, %c0_i32_0 : i32, i32
  }
  func.func @transform_4(%arg0: i32, %arg1: i32) -> (i32, i32) {
    %c0_i32 = arith.constant 0 : i32
    %c0_i32_0 = arith.constant 0 : i32
    %c0_i32_1 = arith.constant 0 : i32
    return %c0_i32, %c0_i32_0 : i32, i32
  }
  func.func @transform_5(%arg0: i32, %arg1: i32) -> (i32, i32, i32) {
    %c0_i32 = arith.constant 0 : i32
    %c0_i32_0 = arith.constant 0 : i32
    return %arg0, %c0_i32, %arg1 : i32, i32, i32
  }
}

</mosaic_0001>

<bundles_post_ra>
// kernel: tpu_custom_call.1
= control target key start
LH: loop header
LB: loop body
LE: loop exit
PB: predicated region body
PF: predicated region fallthrough
CT: control target
= control target key end

     0   :  { %10 = vsyncpa [#allocation3], 0  ;;  %s1004_s0 = inlined_call_operand.vmem [shape: f32[2,4,128], index: 0, kind: input, shape index: {}]   ;;  %s1005_s1 = inlined_call_operand.hbm [shape: f32[2,4,128], index: 1, kind: input, shape index: {}]   ;;  %s1006_s2 = inlined_call_operand.vmem [shape: f32[4,4], index: 2, kind: input, shape index: {}]   ;;  %s1007_s3 = inlined_call_operand.vmem [shape: f32[4,4], index: 3, kind: input, shape index: {}]   ;;  %s1008_s4 = inlined_call_operand.vmem [shape: f32[8,1], index: 4, kind: input, shape index: {}]   ;;  %s1009_s5 = inlined_call_operand.hbm [shape: f32[2,8,128], index: 5, kind: output, shape index: {}]  }
   0x1   :  { %12 = vsyncpa [#allocation3 + $0x1], 0 }
   0x2   :  { %13 = vsyncpa [#allocation4], 0 }
   0x3   :  { %15 = vsyncpa [#allocation4 + $0x1], 0  ;;  %s814_s18 = smov 0   ;;  %s816_s19 = smov 0  }
   0x4   :  { %s818_s20 = smov 0   ;;  %s820_s21 = smov 0  }
   0x5   :  { %s822_s22 = smov 0   ;;  %s824_s23 = smov 0  }
   0x6 LB: > { %s567_s24 = sadd.s32 4294967295, %s777_s23   ;;  %s568_s25 = sadd.s32 4294967294, %s777_s23   ;;  %s777_s23 = sphi %s824_s23, %s21_s23   ;;  %s773_s22 = sphi %s822_s22, %s1025_s22   ;;  %s769_s21 = sphi %s820_s21, %s1024_s21   ;;  %s765_s20 = sphi %s818_s20, %s1023_s20   ;;  %s761_s19 = sphi %s816_s19, %s1022_s19   ;;  %s757_s18 = sphi %s814_s18, %s1021_s18  }
   0x7   : > { %s33_s26 = sadd.s32 1, %s773_s22  ;;  %s70_s27 = sadd.s32 1, %s765_s20 }
   0x8   : > { %p35_p0 = scmp.ge.s32.totalorder %s33_s26, 2  ;;  %p77_p1 = scmp.ne.s32.totalorder %s765_s20, %s761_s19 }
   0x9   : > { %p78_p2 = scmp.eq.s32.totalorder %s777_s23, 0  ;;  %p83_p3 = scmp.ne.s32.totalorder %s761_s19, %s757_s18 }
   0xa   : > { %s1027_s26 = smov (%p35_p0, %s33_s26), 0  ;;  %p84_p5 = scmp.eq.s32.totalorder %s567_s24, 0 }
   0xb   : > { %p855_p4 = por %p78_p2, %p77_p1  ;;  %s65_s29 = ssub.s32 %s773_s22, %s1027_s26 }
   0xc   : > { %p172_p6 = scmp.eq.s32.totalorder %s567_s24, 1  ;;  %p68_p7 = scmp.eq.s32.totalorder %s65_s29, 0 }
   0xd   : > { %p861_p8 = por %p84_p5, %p83_p3  ;;  %p178_p10 = scmp.eq.s32.totalorder %s568_s25, 1 }
   0xe   : > { %p865_p9 = por %p172_p6, %p77_p1  ;;  %p611_p13 = scmp.lt.s32.totalorder %s777_s23, 2 }
   0xf   : > { %s870_s7 = scalar_select %p68_p7, %s765_s20, %s70_s27  }
  0x10   : > { %s1013_s6 = scalar_select %p865_p9, 1, 0 }
  0x11   : > { %p872_p11 = por %p178_p10, %p83_p3  ;;  %s217_s9 = sand.u32 1, %s765_s20  }
  0x12   : > { %s571_s10 = sshll.u32 %s217_s9, 2  ;;  %s572_s11 = sshll.u32 %s773_s22, 6 }
  0x13   : > { %s1014_s8 = scalar_select %p872_p11, 1, 0 }
  0x14   : > { %s883_s14 = scalar_lea.hbm %s1005_s1, %s572_s11  ;;  %s221_s15 = scalar_lea.vmem [#allocation2], %s571_s10 }
  0x15   : > { %s229_s16 = sshll.u32 %s221_s15, 4  ;;  %p889_p0 = pnand %p611_p13, %p855_p4  ;;  %s885_s16 = int_to_ptr.vmem [resolvable:$true] %s229_s16 }
  0x16   : > { %s218_s24 = scalar_lea.sflag [#allocation3], %s217_s9  ;;  %s665_s25 = scalar_lea.hbm %s883_s14, 64 }
  0x17   : > { %p666_p3 = scmp.ne.s32.totalorder %s883_s14, %s665_s25  ;;  %p667_p5 = pneg %p889_p0 }
  0x18   : > { %s670_s28 = scalar_lea.hbm %s1005_s1, 128  ;;  %p671_p4 = scmp.lt.u32.totalorder %s883_s14, %s1005_s1 }
  0x19   : > { %p668_p6 = pnand %p667_p5, %p666_p3  ;;  %p672_p10 = scmp.lt.u32.totalorder %s670_s28, %s665_s25 }
  0x1a   : > { %p674_p12 = scmp.lt.u32.totalorder %s665_s25, %s883_s14 }
  0x1b   : > { %p669_p7 = pneg %p668_p6  ;;  %p673_p13 = por %p672_p10, %p671_p4 }
  0x1d   : > { %p675_p1 = por %p674_p12, %p673_p13 }
  0x1f   : > { %p676_p2 = pnand %p675_p1, %p669_p7 }
  0x21   : > { %679 = shalt.err (!%p676_p2)
}
  0x22   : > { %s680_s9 = scalar_lea.vmem %s885_s16, 64  ;;  %s779_s12 = smov [#allocation2]  }
  0x23   : > { %p681_p3 = scmp.ne.s32.totalorder %s885_s16, %s680_s9  ;;  %s685_s13 = sshll.u32 %s779_s12, 4  ;;  %s686_s13 = int_to_ptr.vmem [resolvable:$false] %s685_s13 }
  0x24   : > { %s687_s15 = scalar_lea.vmem %s686_s13, 128  ;;  %p688_p9 = scmp.lt.s32.totalorder %s885_s16, %s686_s13 }
  0x25   : > { %p683_p6 = pnand %p681_p3, %p667_p5  ;;  %p689_p4 = scmp.lt.s32.totalorder %s687_s15, %s680_s9 }
  0x27   : > { %p684_p11 = pneg %p683_p6  ;;  %p690_p10 = por %p689_p4, %p688_p9 }
  0x29   : > { %p691_p12 = pnand %p690_p10, %p684_p11 }
  0x2b   : > { %694 = shalt.err (!%p691_p12)
}
  0x2c   : > { %606 = dma.hbm_to_vmem [thread:$0]  (!%p889_p0), %s883_s14, 64, %s885_s16, %s218_s24  }
  0x2d   : > { %p1016_p1 = scmp.lt.s32.totalorder %s777_s23, 3  ;;  %p1017_p2 = scmp.ge.s32.totalorder %s777_s23, 1 }
  0x2f   : > { %p235_p5 = pnand %p1017_p2, %p1016_p1 }
  0x30   : > { %s925_s25 = sand.u32 (!%p235_p5), 1, %s761_s19  }
  0x31   : > { %238 = sbr.rel (%p235_p5) target bundleno = 296 (0x128), region = 40  ;;  %s574_s27 = sshll.u32 (!%p235_p5), %s925_s25, 2 }
  0x32   : > { %s241_s29 = scalar_lea.sflag (!%p235_p5), [#allocation3], %s925_s25  ;;  %s244_s28 = scalar_lea.vmem (!%p235_p5), [#allocation2], %s574_s27 }
  0x38   : > { %748 = dma.done.wait (%p861_p8), %s241_s29, 64  }
  0x39   : > { %750 = vsyncadd (%p861_p8), %s241_s29, 4294967232  ;;  %p278_p9 = scmp.lt.s32.totalorder %s769_s21, 1  ;;  %v780_v0 = vmov 0.0   ;;  %vm781_vm0 = vmmov 0   ;;  %v782_v1 = vmov 0   ;;  %vm294_vm1 = vcmask 1043456  }
  0x3a   : > { %594 = vmatprep.subr.mxu1 %v780_v0  ;;  %589 = vmatprep.subr.mxu0 %v780_v0  ;;  %v287_v2 = vld [vmem:[%s244_s28] sm:$0xf]  ;;  %vm290_vm2 = vcmask 31744   ;;  %s575_s27 = sshll.u32 %s925_s25, 3  ;;  %s582_s29 = sshll.u32 %s769_s21, 7 }
  0x3b   : > { %596 = vmatprep.mubr.msk.f32.mxu1 %vm781_vm0, %v780_v0  ;;  %s279_s14 = scalar_select %p278_p9, %s769_s21, 1  ;;  %591 = vmatprep.mubr.msk.f32.mxu0 %vm781_vm0, %v780_v0  ;;  %v368_v4 = vld [vmem:[%s1007_s3] sm:$0xf]  ;;  %v288_v5 = vmax.f32 %v287_v2, 0.0 }
  0x3c   : > { %664 = vset.pattern.permute.xlu0 %v782_v1  ;;  %v289_v7 = vld [vmem:[%s1006_s2] sm:$0xf]  ;;  %s277_s28 = scalar_lea.vmem [#allocation5], %s575_s27  ;;  %s955_s24 = scalar_lea.hbm %s1009_s5, %s582_s29 }
  0x3d   : > { %s576_s16 = sshll.u32 %s279_s14, 2  ;;  %v449_v8 = vld [vmem:[%s1008_s4] sm:$0xff]  ;;  %595 = vmatpush3.msk.msra.mxu1 %vm294_vm1, %v288_v5  ;;  %s472_s14 = sshll.u32 %s277_s28, 4  ;;  %s957_s14 = int_to_ptr.vmem [resolvable:$true] %s472_s14 }
  0x3e   : > { %s284_s10 = scalar_lea.vmem %s1004_s0, %s576_s16  ;;  %452 = vperm.xlu0 %664, %v449_v8   ;;  %597 = vmatmul.mubr.msk.f32.vlgmr.msra.gmra.mrb[0].mxu1 %vm290_vm2, %v368_v4  ;;  %s695_s30 = scalar_lea.vmem %s957_s14, 128 }
  0x3f   : > { %v285_v3 = vld [vmem:[%s284_s10] sm:$0xf]  ;;  %s458_s10 = scalar_lea.sflag [#allocation4], %s925_s25  ;;  %p696_p8 = scmp.ne.s32.totalorder %s957_s14, %s695_s30 }
  0x40   : > { %v286_v6 = vmax.f32 %v285_v3, 0.0  ;;  %p1018_p11 = scmp.ne.s32.totalorder %s1013_s6, 0  ;;  %s783_s21 = smov [#allocation5]  }
  0x41   : > { %s699_s11 = sshll.u32 %s783_s21, 4  ;;  %s700_s11 = int_to_ptr.vmem [resolvable:$false] %s699_s11 }
  0x42   : > { %590 = vmatpush3.msk.msra.mxu0 %vm294_vm1, %v286_v6  ;;  %p697_p0 = pnand %p696_p8, %p1018_p11  ;;  %s701_s9 = scalar_lea.vmem %s700_s11, 256 }
  0x43   : > { %592 = vmatmul.mubr.msk.f32.vlgmr.msra.gmra.mrb[0].mxu0 %vm290_vm2, %v289_v7  ;;  %p702_p13 = scmp.lt.s32.totalorder %s957_s14, %s700_s11  ;;  %p703_p3 = scmp.lt.s32.totalorder %s701_s9, %s695_s30 }
  0x44   : > { %p698_p7 = pneg %p697_p0 }
  0x45   : > { %p704_p6 = por %p703_p3, %p702_p13 }
  0x47   : > { %p705_p4 = pnand %p704_p6, %p698_p7 }
  0xbd   : > { %v453_v9 = vpop.permute.xlu0 %452 }
 0x111   : > { %v441_v10 = vpop.f32.mrb[0].mxu1 }
 0x112   : > { %v446_v12 = vrot.slane %v441_v10, 4  ;;  %v598_v13 = vpop.f32.mrb[1].mxu1 }
 0x116   : > { %v364_v11 = vpop.f32.mrb[0].mxu0 }
 0x117   : > { %v593_v14 = vpop.f32.mrb[1].mxu0  ;;  %v448_v15 = vsel %vm294_vm1, %v364_v11, %v446_v12 }
 0x118   : > { %v455_v16 = vadd.f32 %v453_v9, %v448_v15 }
 0x11a   : > { %456 = vst [vmem:[%s277_s28] sm:$0xff] %v455_v16 }
 0x11b   : > { %708 = shalt.err (!%p705_p4)
}
 0x11c   : > { %s709_s25 = scalar_lea.hbm %s955_s24, 128  ;;  %s713_s15 = scalar_lea.hbm %s1009_s5, 256 }
 0x11d   : > { %p710_p10 = scmp.ne.s32.totalorder %s955_s24, %s709_s25  ;;  %p714_p2 = scmp.lt.u32.totalorder %s955_s24, %s1009_s5 }
 0x11e   : > { %p715_p5 = scmp.lt.u32.totalorder %s713_s15, %s709_s25  ;;  %p717_p8 = scmp.lt.u32.totalorder %s709_s25, %s955_s24 }
 0x11f   : > { %p711_p12 = pnand %p710_p10, %p1018_p11 }
 0x120   : > { %p716_p9 = por %p715_p5, %p714_p2 }
 0x121   : > { %p712_p1 = pneg %p711_p12 }
 0x122   : > { %p718_p0 = por %p717_p8, %p716_p9 }
 0x124   : > { %p719_p7 = pnand %p718_p0, %p712_p1 }
 0x126   : > { %722 = shalt.err (!%p719_p7)
}
 0x127   : > { %601 = dma.vmem_to_hbm [thread:$0]  (%p1018_p11), %s957_s14, 128, %s955_s24, %s458_s10  }
 0x128 PF: > { %s484_s28 = sand.u32 1, %s757_s18   ;;  %p1019_p13 = scmp.ne.s32.totalorder %s1014_s8, 0 }
 0x129   : > { %p1020_p3 = scmp.ge.s32.totalorder %s777_s23, 2  ;;  %s485_s16 = scalar_lea.sflag [#allocation4], %s484_s28 }
 0x12b   : > { %p608_p6 = pnand %p1020_p3, %p1019_p13 }
 0x12d   : > { %752 = dma.done.wait (!%p608_p6), %s485_s16, 128  }
 0x12e   : > { %754 = vsyncadd (!%p608_p6), %s485_s16, 4294967168  ;;  %s21_s23 = sadd.s32 1, %s777_s23   ;;  %s1021_s18 = smov %s761_s19 }
 0x12f   : > { %p18_p4 = scmp.ge.s32.totalorder %s21_s23, 4   ;;  %s1022_s19 = smov %s765_s20 }
 0x130   : > { %s1023_s20 = smov %s870_s7  ;;  %s1024_s21 = smov %s773_s22 }
 0x131   : > { %s1025_s22 = smov %s1027_s26  ;;  %20 = sbr.rel (!%p18_p4) target bundleno = 6 (0x6), region = 88 }
 0x138   :  { %490 = vsyncpa [#allocation3], 1 }
 0x139   :  { %492 = vsyncpa [#allocation3 + $0x1], 1 }
 0x13a   :  { %493 = vsyncpa [#allocation4], 1 }
 0x13b   :  { %495 = vsyncpa [#allocation4 + $0x1], 1 }

</bundles_post_ra>
